<compile_context>
chip_gen: v7x
topology: tpu7x:2x2x1
jax: 0.10.0
libtpu: 0.0.40
codegen_flags: <defaults>
</compile_context>

<pallas_src>
import functools

import jax
import jax.numpy as jnp
from jax.experimental import pallas as pl
from jax.experimental.pallas import tpu as pltpu


# ---------------------------------------------------------------------------
# helpers
# ---------------------------------------------------------------------------
def _round_up(x, m):
    return (x + m - 1) // m * m


def _cdiv(a, b):
    return -(-a // b)


def _pad_axis(x, target, axis):
    if x.shape[axis] == target:
        return x
    pad = [(0, 0)] * x.ndim
    pad[axis] = (0, target - x.shape[axis])
    return jnp.pad(x, pad)


def _pad_gate_cols(w, h, hp):
    """(..., G*h) -> (..., G*hp): zero-pad every h-wide gate block to hp lanes."""
    g = w.shape[-1] // h
    w = w.reshape(w.shape[:-1] + (g, h))
    w = _pad_axis(w, hp, axis=-1)
    return w.reshape(w.shape[:-2] + (g * hp,))


def _per_graph_vmem_bytes(Np, Hp, cd_bytes, fold_edges):
    """Rough per-graph VMEM cost: double-buffered DMA blocks + f32 temps."""
    wide = 9 if fold_edges else 5
    return (
        2 * 2 * Np * Np * cd_bytes          # A_in + A_out blocks (double-buffered)
        + 2 * 2 * Np * Hp * cd_bytes        # hidden-in + hidden-out blocks
        + Np * Hp * 4                       # f32 hidden state
        + Np * wide * Hp * 4                # fused hidden-GEMM output + bias bcast
        + Np * 6 * Hp * cd_bytes            # edge-feature operands of A-contraction
        + Np * 9 * Hp * 4                   # gi, contraction partials, gate temps
    )


def _pick_block_batch(B, Np, Hp, cd_bytes, fold_edges, target_m=512,
                      vmem_budget_bytes=36 << 20):
    """Choose bblk so m = bblk*Np ~ target_m, bounded by a VMEM budget that
    includes in-kernel intermediates (v7x-safe). Batch is padded to fit."""
    per_graph = _per_graph_vmem_bytes(Np, Hp, cd_bytes, fold_edges)
    max_by_vmem = max(1, vmem_budget_bytes // per_graph)
    cap = int(max(1, min(max(1, target_m // Np), max_by_vmem)))
    n_blocks = _cdiv(B, cap)
    bblk = _cdiv(B, n_blocks)           # balance blocks -> minimal padding
    return bblk, n_blocks


# ---------------------------------------------------------------------------
# kernels
# ---------------------------------------------------------------------------
def _gru_update(gi, gh, hcur, hp):
    """Gate math in f32; slices are lane-aligned (hp multiple of 128)."""
    i_r, i_i, i_n = gi[:, :hp], gi[:, hp:2 * hp], gi[:, 2 * hp:]
    h_r, h_i, h_n = gh[:, :hp], gh[:, hp:2 * hp], gh[:, 2 * hp:]
    resetgate = jax.nn.sigmoid(i_r + h_r)
    inputgate = jax.nn.sigmoid(i_i + h_i)
    newgate = jnp.tanh(i_n + resetgate * h_n)
    return newgate + inputgate * (hcur - newgate)


def _run_steps(step, cell, h):
    if step <= 2:
        for _ in range(step):
            h = cell(h)
        return h
    # Bounded live ranges / code size for larger step counts.
    return jax.lax.fori_loop(0, step, lambda _, hh: cell(hh), h, unroll=True)


def _gnn_kernel_fold(a_in_ref, a_out_ref, h_ref, w_ref, b_w_ref, b_gi_ref,
                     out_ref, *, step, bblk, n, hp, compute_dtype):
    """Folded path (2*Np <= Hp): one (m,Hp)@(Hp,9Hp) GEMM per step.

    Columns of the fused weight: [0,3hp) = W_ein@W_gin, [3hp,6hp) = W_eout@W_gout,
    [6hp,9hp) = W_hh (r,i,n gates). gi = A_in@fin + A_out@fout + b_gi.
    """
    m = bblk * n
    f32 = jnp.float32

    h = h_ref[...].astype(f32)                           # (m, hp) f32 state
    a_in = a_in_ref[...]                                 # (bblk, n, n)
    a_out = a_out_ref[...]
    w = w_ref[...]                                       # (hp, 9hp)
    # Hoisted bias broadcasts (not re-materialised per unrolled step).
    b_w = jnp.broadcast_to(b_w_ref[...].astype(f32), (m, 9 * hp))
    b_gi = jnp.broadcast_to(b_gi_ref[...].astype(f32), (m, 3 * hp))

    def cell(hcur):
        hw = jnp.dot(hcur.astype(compute_dtype), w,
                     preferred_element_type=f32) + b_w               # (m, 9hp)
        fin = hw[:, :3 * hp].astype(compute_dtype).reshape(bblk, n, 3 * hp)
        fout = hw[:, 3 * hp:6 * hp].astype(compute_dtype).reshape(bblk, n, 3 * hp)
        gh = hw[:, 6 * hp:]                                          # (m, 3hp)
        gi = (jnp.einsum('bij,bjh->bih', a_in, fin,
                         preferred_element_type=f32)
              + jnp.einsum('bij,bjh->bih', a_out, fout,
                           preferred_element_type=f32))
        gi = gi.reshape(m, 3 * hp) + b_gi
        return _gru_update(gi, gh, hcur, hp)

    h = _run_steps(step, cell, h)
    out_ref[...] = h.astype(out_ref.dtype)               # lane-dense store


def _gnn_kernel_nofold(a_in_ref, a_out_ref, h_ref, w_h_ref, b_h_ref,
                       w_gi_ref, b_gi_ref, out_ref,
                       *, step, bblk, n, hp, compute_dtype):
    """Fallback path (large graphs): fused hidden GEMM (Hp,5Hp) + single
    K=2Hp gi GEMM (fills the 256-deep MXU on v6e/v7x)."""
    m = bblk * n
    f32 = jnp.float32

    h = h_ref[...].astype(f32)
    a_in = a_in_ref[...]
    a_out = a_out_ref[...]
    w_h = w_h_ref[...]                                   # (hp, 5hp)
    w_gi = w_gi_ref[...]                                 # (2hp, 3hp) stacked
    b_h = jnp.broadcast_to(b_h_ref[...].astype(f32), (m, 5 * hp))
    b_gi = jnp.broadcast_to(b_gi_ref[...].astype(f32), (m, 3 * hp))

    def cell(hcur):
        hw = jnp.dot(hcur.astype(compute_dtype), w_h,
                     preferred_element_type=f32) + b_h               # (m, 5hp)
        edge_in = hw[:, :hp].astype(compute_dtype).reshape(bblk, n, hp)
        edge_out = hw[:, hp:2 * hp].astype(compute_dtype).reshape(bblk, n, hp)
        gh = hw[:, 2 * hp:]
        inp_in = jnp.einsum('bij,bjh->bih', a_in, edge_in,
                            preferred_element_type=f32).reshape(m, hp)
        inp_out = jnp.einsum('bij,bjh->bih', a_out, edge_out,
                             preferred_element_type=f32).reshape(m, hp)
        inp = jnp.concatenate([inp_in, inp_out], axis=1).astype(compute_dtype)
        gi = jnp.dot(inp, w_gi, preferred_element_type=f32) + b_gi   # K = 2hp
        return _gru_update(gi, gh, hcur, hp)

    h = _run_steps(step, cell, h)
    out_ref[...] = h.astype(out_ref.dtype)


# ---------------------------------------------------------------------------
# parameter preparation (all folds done in f32, exact)
# ---------------------------------------------------------------------------
def _prepare_params(params, H, Hp, compute_dtype, fold_edges):
    f32 = jnp.float32
    w_ein = params["w_ein_t"].astype(f32)                # (H, H)
    w_eout = params["w_eout_t"].astype(f32)
    w_hh = params["w_hh_t"].astype(f32)                  # (H, 3H)
    w_gin = params["w_ih_t"][:H, :].astype(f32)          # (H, 3H)
    w_gout = params["w_ih_t"][H:, :].astype(f32)         # (H, 3H)
    b_ein = params["b_ein"].astype(f32)
    b_eout = params["b_eout"].astype(f32)
    b_hh = params["b_hh"].astype(f32)
    b_ih = params["b_ih"].astype(f32)
    b_iah = params["b_iah"].astype(f32)
    b_oah = params["b_oah"].astype(f32)

    def gate_pad_w(w):                                   # (H,3H) -> (Hp,3Hp)
        return _pad_axis(_pad_gate_cols(w, H, Hp), Hp, 0)

    # b_iah / b_oah folded into the gi bias (exact: they broadcast over rows).
    b_gi = _pad_gate_cols(b_ih + b_iah @ w_gin + b_oah @ w_gout, H, Hp)

    if fold_edges:
        # gi = A_in@(h@(W_ein@W_gin) + b_ein@W_gin)
        #    + A_out@(h@(W_eout@W_gout) + b_eout@W_gout) + b_gi   (exact)
        w_big = jnp.concatenate([gate_pad_w(w_ein @ w_gin),
                                 gate_pad_w(w_eout @ w_gout),
                                 gate_pad_w(w_hh)], axis=1)        # (Hp, 9Hp)
        b_big = jnp.concatenate([_pad_gate_cols(b_ein @ w_gin, H, Hp),
                                 _pad_gate_cols(b_eout @ w_gout, H, Hp),
                                 _pad_gate_cols(b_hh, H, Hp)], axis=1)  # (1,9Hp)
        return dict(w=w_big.astype(compute_dtype), b_w=b_big, b_gi=b_gi)

    w_h = jnp.concatenate([_pad_axis(_pad_axis(w_ein, Hp, 1), Hp, 0),
                           _pad_axis(_pad_axis(w_eout, Hp, 1), Hp, 0),
                           gate_pad_w(w_hh)], axis=1)              # (Hp, 5Hp)
    b_h = jnp.concatenate([_pad_axis(b_ein, Hp, 1),
                           _pad_axis(b_eout, Hp, 1),
                           _pad_gate_cols(b_hh, H, Hp)], axis=1)   # (1, 5Hp)
    w_gi = jnp.concatenate([gate_pad_w(w_gin), gate_pad_w(w_gout)],
                           axis=0)                                 # (2Hp, 3Hp)
    return dict(w=w_h.astype(compute_dtype), b_w=b_h,
                w_gi=w_gi.astype(compute_dtype), b_gi=b_gi)


# ---------------------------------------------------------------------------
# wrapper
# ---------------------------------------------------------------------------
@functools.partial(jax.jit, static_argnames=("step", "compute_dtype",
                                             "block_batch", "fold_edges"))
def gnn_forward(A, hidden, params, step=1, compute_dtype=jnp.bfloat16,
                block_batch=None, fold_edges=None):
    """SR-GNN GNN.forward: `step` GNNCell iterations inside one kernel."""
    B, N, H = hidden.shape
    assert A.shape == (B, N, 2 * N)
    Np = _round_up(N, 8)              # sublane-aligned node count
    Hp = _round_up(H, 128)            # lane-aligned hidden size
    if fold_edges is None:
        fold_edges = (2 * Np <= Hp)   # algebraic fold only pays when N << H
    cd_bytes = jnp.dtype(compute_dtype).itemsize

    prep = _prepare_params(params, H, Hp, compute_dtype, fold_edges)

    # Batch-block size from MXU/VMEM targets; batch zero-padded to fit.
    if block_batch is None:
        bblk, n_blocks = _pick_block_batch(B, Np, Hp, cd_bytes, fold_edges)
    else:
        bblk = int(block_batch)
        n_blocks = _cdiv(B, bblk)
    Bp = bblk * n_blocks
    m = bblk * Np

    # Pre-split adjacency halves (lane-dense), pad nodes/batch, cast operands.
    a_in = _pad_axis(_pad_axis(_pad_axis(A[:, :, :N], Np, 2), Np, 1), Bp, 0)
    a_out = _pad_axis(_pad_axis(_pad_axis(A[:, :, N:2 * N], Np, 2), Np, 1), Bp, 0)
    a_in = a_in.astype(compute_dtype)
    a_out = a_out.astype(compute_dtype)
    # Hidden carried through HBM in compute dtype (bf16 default) -> half traffic.
    h_p = _pad_axis(_pad_axis(_pad_axis(hidden.astype(jnp.float32), Hp, 2),
                              Np, 1), Bp, 0)
    h_flat = h_p.reshape(Bp * Np, Hp).astype(compute_dtype)

    # VMEM budget including in-kernel f32 intermediates (v7x 64 MiB safe).
    per_graph = _per_graph_vmem_bytes(Np, Hp, cd_bytes, fold_edges)
    w_elems = (9 if fold_edges else 11) * Hp * Hp
    weight_bytes = 2 * (w_elems * cd_bytes + 12 * Hp * 4)
    vmem_limit = int(min(48 << 20,
                         max(32 << 20,
                             weight_bytes + bblk * per_graph + (4 << 20))))

    common_specs = [
        pl.BlockSpec((bblk, Np, Np), lambda b: (b, 0, 0)),    # A_in
        pl.BlockSpec((bblk, Np, Np), lambda b: (b, 0, 0)),    # A_out
        pl.BlockSpec((m, Hp), lambda b: (b, 0)),              # hidden
    ]
    if fold_edges:
        kernel = functools.partial(_gnn_kernel_fold, step=int(step), bblk=bblk,
                                   n=Np, hp=Hp, compute_dtype=compute_dtype)
        in_specs = common_specs + [
            pl.BlockSpec((Hp, 9 * Hp), lambda b: (0, 0)),     # W_big fused
            pl.BlockSpec((1, 9 * Hp), lambda b: (0, 0)),      # b_big
            pl.BlockSpec((1, 3 * Hp), lambda b: (0, 0)),      # b_gi
        ]
        args = (a_in, a_out, h_flat, prep["w"], prep["b_w"], prep["b_gi"])
    else:
        kernel = functools.partial(_gnn_kernel_nofold, step=int(step), bblk=bblk,
                                   n=Np, hp=Hp, compute_dtype=compute_dtype)
        in_specs = common_specs + [
            pl.BlockSpec((Hp, 5 * Hp), lambda b: (0, 0)),     # W_h fused
            pl.BlockSpec((1, 5 * Hp), lambda b: (0, 0)),      # b_h
            pl.BlockSpec((2 * Hp, 3 * Hp), lambda b: (0, 0)),  # W_gi stacked (K=2Hp)
            pl.BlockSpec((1, 3 * Hp), lambda b: (0, 0)),      # b_gi
        ]
        args = (a_in, a_out, h_flat, prep["w"], prep["b_w"],
                prep["w_gi"], prep["b_gi"])

    out_flat = pl.pallas_call(
        kernel,
        out_shape=jax.ShapeDtypeStruct((Bp * Np, Hp), compute_dtype),
        grid=(n_blocks,),
        in_specs=in_specs,
        out_specs=pl.BlockSpec((m, Hp), lambda b: (b, 0)),
        compiler_params=pltpu.CompilerParams(
            dimension_semantics=("parallel",),
            vmem_limit_bytes=vmem_limit),
    )(*args)

    out = out_flat.reshape(Bp, Np, Hp)[:B, :N, :H]
    return out.astype(hidden.dtype)


# ---------------------------------------------------------------------------
# pure-JAX reference (mirrors the PyTorch semantics, unfused)
# ---------------------------------------------------------------------------
def gnn_forward_ref(A, hidden, params, step=1):
    N = A.shape[1]
    H = hidden.shape[2]
    for _ in range(step):
        edge_in = hidden @ params["w_ein_t"] + params["b_ein"]
        edge_out = hidden @ params["w_eout_t"] + params["b_eout"]
        input_in = A[:, :, :N] @ edge_in + params["b_iah"]
        input_out = A[:, :, N:2 * N] @ edge_out + params["b_oah"]
        inputs = jnp.concatenate([input_in, input_out], axis=2)
        gi = inputs @ params["w_ih_t"] + params["b_ih"]
        gh = hidden @ params["w_hh_t"] + params["b_hh"]
        i_r, i_i, i_n = gi[..., :H], gi[..., H:2 * H], gi[..., 2 * H:]
        h_r, h_i, h_n = gh[..., :H], gh[..., H:2 * H], gh[..., 2 * H:]
        resetgate = jax.nn.sigmoid(i_r + h_r)
        inputgate = jax.nn.sigmoid(i_i + h_i)
        newgate = jnp.tanh(i_n + resetgate * h_n)
        hidden = newgate + inputgate * (hidden - newgate)
    return hidden


def init_params(key, hidden_size):
    """Deterministic init matching the PyTorch parameter shapes (stored
    transposed for x @ W; biases as (1, K) rows)."""
    H = hidden_size
    stdv = 1.0 / (H ** 0.5)
    ks = jax.random.split(key, 10)
    u = lambda k, shape: jax.random.uniform(
        k, shape, jnp.float32, minval=-stdv, maxval=stdv)
    return {
        "w_ih_t":  u(ks[0], (2 * H, 3 * H)),   # transpose of (3H, 2H)
        "w_hh_t":  u(ks[1], (H, 3 * H)),       # transpose of (3H, H)
        "b_ih":    u(ks[2], (1, 3 * H)),
        "b_hh":    u(ks[3], (1, 3 * H)),
        "b_iah":   u(ks[4], (1, H)),
        "b_oah":   u(ks[5], (1, H)),
        "w_ein_t": u(ks[6], (H, H)),           # linear_edge_in.weight.T
        "b_ein":   u(ks[7], (1, H)),
        "w_eout_t": u(ks[8], (H, H)),          # linear_edge_out.weight.T
        "b_eout":  u(ks[9], (1, H)),
        # TODO(synk): linear_edge_f exists in __init__ but is unused in forward.
    }


if __name__ == "__main__":
    B, N, H = 2, 8, 32

    key = jax.random.PRNGKey(0)
    k_a, k_h, k_p = jax.random.split(key, 3)

    A = jax.random.uniform(k_a, (B, N, 2 * N), jnp.float32)
    A = A / jnp.maximum(A.sum(axis=1, keepdims=True), 1e-6)
    hidden = jax.random.normal(k_h, (B, N, H), jnp.float32)
    params = init_params(k_p, H)

    # Default (edge-folded) path, step = 1 and 2.
    for step in (1, 2):
        ref = gnn_forward_ref(A, hidden, params, step=step)

        out_f32 = jax.block_until_ready(
            gnn_forward(A, hidden, params, step=step,
                        compute_dtype=jnp.float32))
        assert out_f32.shape == (B, N, H)
        assert jnp.allclose(out_f32, ref, rtol=2e-3, atol=2e-3), \
            "f32 folded kernel mismatch vs reference"

        out_bf16 = jax.block_until_ready(
            gnn_forward(A, hidden, params, step=step))
        assert jnp.allclose(out_bf16, ref, rtol=5e-2, atol=5e-2), \
            "bf16 folded kernel mismatch vs reference"

    # Fallback (non-folded, fused K=2Hp gi GEMM) path, used for large graphs.
    ref1 = gnn_forward_ref(A, hidden, params, step=1)
    out_nf_f32 = jax.block_until_ready(
        gnn_forward(A, hidden, params, step=1, compute_dtype=jnp.float32,
                    fold_edges=False))
    assert jnp.allclose(out_nf_f32, ref1, rtol=2e-3, atol=2e-3), \
        "f32 non-folded kernel mismatch vs reference"
    out_nf_bf16 = jax.block_until_ready(
        gnn_forward(A, hidden, params, step=1, fold_edges=False))
    assert jnp.allclose(out_nf_bf16, ref1, rtol=5e-2, atol=5e-2), \
        "bf16 non-folded kernel mismatch vs reference"

    print("KERNEL_OK")
</pallas_src>

<mosaic_0001>
module attributes {stable_mosaic.version = 11 : i64} {
  func.func @_gnn_kernel_fold(%arg0: i32, %arg1: memref<2x8x8xf32, #tpu.memory_space<vmem>>, %arg2: memref<2x8x8xf32, #tpu.memory_space<vmem>>, %arg3: memref<16x128xf32, #tpu.memory_space<vmem>>, %arg4: memref<128x1152xf32, #tpu.memory_space<vmem>>, %arg5: memref<1x1152xf32, #tpu.memory_space<vmem>>, %arg6: memref<1x384xf32, #tpu.memory_space<vmem>>, %arg7: memref<16x128xf32, #tpu.memory_space<vmem>>) attributes {dimension_semantics = [#tpu.dimension_semantics<parallel>], iteration_bounds = array<i64: 1>, scalar_prefetch = 0 : i64, scratch_operands = 0 : i64, tpu.core_type = #tpu.core_type<tc>, window_params = [{transform_indices = @transform_0, window_bounds = array<i64: 2, 8, 8>}, {transform_indices = @transform_1, window_bounds = array<i64: 2, 8, 8>}, {transform_indices = @transform_2, window_bounds = array<i64: 16, 128>}, {pipeline_mode = #tpu.pipeline_mode<synchronous>, transform_indices = @transform_3, window_bounds = array<i64: 128, 1152>}, {pipeline_mode = #tpu.pipeline_mode<synchronous>, transform_indices = @transform_4, window_bounds = array<i64: 1, 1152>}, {pipeline_mode = #tpu.pipeline_mode<synchronous>, transform_indices = @transform_5, window_bounds = array<i64: 1, 384>}, {transform_indices = @transform_6, window_bounds = array<i64: 16, 128>}]} {
    %c0 = arith.constant 0 : index
    %c0_0 = arith.constant 0 : index
    %0 = vector.load %arg3[%c0, %c0_0] : memref<16x128xf32, #tpu.memory_space<vmem>>, vector<16x128xf32>
    %c0_1 = arith.constant 0 : index
    %c0_2 = arith.constant 0 : index
    %c0_3 = arith.constant 0 : index
    %1 = vector.load %arg1[%c0_1, %c0_2, %c0_3] : memref<2x8x8xf32, #tpu.memory_space<vmem>>, vector<2x8x8xf32>
    %c0_4 = arith.constant 0 : index
    %c0_5 = arith.constant 0 : index
    %c0_6 = arith.constant 0 : index
    %2 = vector.load %arg2[%c0_4, %c0_5, %c0_6] : memref<2x8x8xf32, #tpu.memory_space<vmem>>, vector<2x8x8xf32>
    %c0_7 = arith.constant 0 : index
    %c0_8 = arith.constant 0 : index
    %3 = vector.load %arg4[%c0_7, %c0_8] : memref<128x1152xf32, #tpu.memory_space<vmem>>, vector<128x1152xf32>
    %c0_9 = arith.constant 0 : index
    %c0_10 = arith.constant 0 : index
    %4 = vector.load %arg5[%c0_9, %c0_10] : memref<1x1152xf32, #tpu.memory_space<vmem>>, vector<1x1152xf32>
    %5 = vector.shape_cast %4 : vector<1x1152xf32> to vector<1x1152xf32>
    %6 = vector.broadcast %5 : vector<1x1152xf32> to vector<16x1152xf32>
    %c0_11 = arith.constant 0 : index
    %c0_12 = arith.constant 0 : index
    %7 = vector.load %arg6[%c0_11, %c0_12] : memref<1x384xf32, #tpu.memory_space<vmem>>, vector<1x384xf32>
    %8 = vector.shape_cast %7 : vector<1x384xf32> to vector<1x384xf32>
    %9 = vector.broadcast %8 : vector<1x384xf32> to vector<16x384xf32>
    %cst = arith.constant dense<0.000000e+00> : vector<16x1152xf32>
    %10 = tpu.matmul %0, %3, %cst {dimension_numbers = #tpu.dot_dimension_numbers<[1], [0], [0], [1], [0, 0, 1, 1], [], []>} : vector<16x128xf32>, vector<128x1152xf32>, vector<16x1152xf32> -> vector<16x1152xf32>
    %11 = arith.addf %10, %6 : vector<16x1152xf32>
    %12 = vector.extract_strided_slice %11 {offsets = [0, 0], sizes = [16, 384], strides = [1, 1]} : vector<16x1152xf32> to vector<16x384xf32>
    %13 = vector.shape_cast %12 : vector<16x384xf32> to vector<2x8x384xf32>
    %14 = vector.extract_strided_slice %11 {offsets = [0, 384], sizes = [16, 384], strides = [1, 1]} : vector<16x1152xf32> to vector<16x384xf32>
    %15 = vector.shape_cast %14 : vector<16x384xf32> to vector<2x8x384xf32>
    %16 = vector.extract_strided_slice %11 {offsets = [0, 768], sizes = [16, 384], strides = [1, 1]} : vector<16x1152xf32> to vector<16x384xf32>
    "tpu.trace_start"() <{level = 10 : i32, message = "bij,bjh->bih"}> : () -> ()
    %cst_13 = arith.constant dense<0.000000e+00> : vector<2x8x384xf32>
    %17 = tpu.matmul %1, %13, %cst_13 {dimension_numbers = #tpu.dot_dimension_numbers<[2], [1], [1], [2], [0, 0, 0, 1, 1, 2], [0], [0]>} : vector<2x8x8xf32>, vector<2x8x384xf32>, vector<2x8x384xf32> -> vector<2x8x384xf32>
    %cst_14 = arith.constant dense<0.000000e+00> : vector<2x8x384xf32>
    %18 = tpu.matmul %2, %15, %cst_14 {dimension_numbers = #tpu.dot_dimension_numbers<[2], [1], [1], [2], [0, 0, 0, 1, 1, 2], [0], [0]>} : vector<2x8x8xf32>, vector<2x8x384xf32>, vector<2x8x384xf32> -> vector<2x8x384xf32>
    "tpu.trace_stop"() : () -> ()
    %19 = arith.addf %17, %18 : vector<2x8x384xf32>
    %20 = vector.shape_cast %19 : vector<2x8x384xf32> to vector<16x384xf32>
    %21 = arith.addf %20, %9 : vector<16x384xf32>
    %22 = vector.extract_strided_slice %21 {offsets = [0, 0], sizes = [16, 128], strides = [1, 1]} : vector<16x384xf32> to vector<16x128xf32>
    %23 = vector.extract_strided_slice %21 {offsets = [0, 128], sizes = [16, 128], strides = [1, 1]} : vector<16x384xf32> to vector<16x128xf32>
    %24 = vector.extract_strided_slice %21 {offsets = [0, 256], sizes = [16, 128], strides = [1, 1]} : vector<16x384xf32> to vector<16x128xf32>
    %25 = vector.extract_strided_slice %16 {offsets = [0, 0], sizes = [16, 128], strides = [1, 1]} : vector<16x384xf32> to vector<16x128xf32>
    %26 = vector.extract_strided_slice %16 {offsets = [0, 128], sizes = [16, 128], strides = [1, 1]} : vector<16x384xf32> to vector<16x128xf32>
    %27 = vector.extract_strided_slice %16 {offsets = [0, 256], sizes = [16, 128], strides = [1, 1]} : vector<16x384xf32> to vector<16x128xf32>
    %28 = arith.addf %22, %25 : vector<16x128xf32>
    %29 = arith.negf %28 : vector<16x128xf32>
    %30 = math.exp %29 : vector<16x128xf32>
    %cst_15 = arith.constant 1.000000e+00 : f32
    %31 = vector.broadcast %cst_15 : f32 to vector<16x128xf32>
    %32 = arith.addf %31, %30 : vector<16x128xf32>
    %33 = arith.divf %31, %32 : vector<16x128xf32>
    %34 = arith.addf %23, %26 : vector<16x128xf32>
    %35 = arith.negf %34 : vector<16x128xf32>
    %36 = math.exp %35 : vector<16x128xf32>
    %cst_16 = arith.constant 1.000000e+00 : f32
    %37 = vector.broadcast %cst_16 : f32 to vector<16x128xf32>
    %38 = arith.addf %37, %36 : vector<16x128xf32>
    %39 = arith.divf %37, %38 : vector<16x128xf32>
    %40 = arith.mulf %33, %27 : vector<16x128xf32>
    %41 = arith.addf %24, %40 : vector<16x128xf32>
    %42 = math.tanh %41 : vector<16x128xf32>
    %43 = arith.subf %0, %42 : vector<16x128xf32>
    %44 = arith.mulf %39, %43 : vector<16x128xf32>
    %45 = arith.addf %42, %44 : vector<16x128xf32>
    %c0_17 = arith.constant 0 : index
    %c0_18 = arith.constant 0 : index
    %46 = vector.load %arg7[%c0_17, %c0_18] : memref<16x128xf32, #tpu.memory_space<vmem>>, vector<16x128xf32>
    tpu.vector_store %arg7[%c0_17, %c0_18], %45 {strides = array<i32>} : memref<16x128xf32, #tpu.memory_space<vmem>>, vector<16x128xf32>,
    return
  }
  func.func @transform_0(%arg0: i32) -> (i32, i32, i32) {
    %c0_i32 = arith.constant 0 : i32
    %c0_i32_0 = arith.constant 0 : i32
    %c0_i32_1 = arith.constant 0 : i32
    return %arg0, %c0_i32, %c0_i32_0 : i32, i32, i32
  }
  func.func @transform_1(%arg0: i32) -> (i32, i32, i32) {
    %c0_i32 = arith.constant 0 : i32
    %c0_i32_0 = arith.constant 0 : i32
    %c0_i32_1 = arith.constant 0 : i32
    return %arg0, %c0_i32, %c0_i32_0 : i32, i32, i32
  }
  func.func @transform_2(%arg0: i32) -> (i32, i32) {
    %c0_i32 = arith.constant 0 : i32
    %c0_i32_0 = arith.constant 0 : i32
    return %arg0, %c0_i32 : i32, i32
  }
  func.func @transform_3(%arg0: i32) -> (i32, i32) {
    %c0_i32 = arith.constant 0 : i32
    %c0_i32_0 = arith.constant 0 : i32
    %c0_i32_1 = arith.constant 0 : i32
    return %c0_i32, %c0_i32_0 : i32, i32
  }
  func.func @transform_4(%arg0: i32) -> (i32, i32) {
    %c0_i32 = arith.constant 0 : i32
    %c0_i32_0 = arith.constant 0 : i32
    %c0_i32_1 = arith.constant 0 : i32
    return %c0_i32, %c0_i32_0 : i32, i32
  }
  func.func @transform_5(%arg0: i32) -> (i32, i32) {
    %c0_i32 = arith.constant 0 : i32
    %c0_i32_0 = arith.constant 0 : i32
    %c0_i32_1 = arith.constant 0 : i32
    return %c0_i32, %c0_i32_0 : i32, i32
  }
  func.func @transform_6(%arg0: i32) -> (i32, i32) {
    %c0_i32 = arith.constant 0 : i32
    %c0_i32_0 = arith.constant 0 : i32
    return %arg0, %c0_i32 : i32, i32
  }
}

</mosaic_0001>

<bundles_post_ra>
// kernel: gnn_forward.1
= control target key start
LH: loop header
LB: loop body
LE: loop exit
PB: predicated region body
PF: predicated region fallthrough
CT: control target
= control target key end

     0   :  { %v1583_v7 = vmov 0.0   ;;  %s2169_s0 = inlined_call_operand.vmem [shape: f32[2,8,8], index: 0, kind: input, shape index: {}]   ;;  %s2170_s1 = inlined_call_operand.vmem [shape: f32[2,8,8], index: 1, kind: input, shape index: {}]   ;;  %s2171_s2 = inlined_call_operand.vmem [shape: f32[16,128], index: 2, kind: input, shape index: {}]   ;;  %s2172_s3 = inlined_call_operand.vmem [shape: f32[128,1152], index: 3, kind: input, shape index: {}]   ;;  %s2173_s4 = inlined_call_operand.vmem [shape: f32[1,1152], index: 4, kind: input, shape index: {}]   ;;  %s2174_s5 = inlined_call_operand.vmem [shape: f32[1,384], index: 5, kind: input, shape index: {}]   ;;  %s2175_s6 = inlined_call_operand.hbm [shape: f32[16,128], index: 6, kind: output, shape index: {}]  }
   0x1   :  { %v31_v0 = vld [vmem:[%s2172_s3 + $0x8] sm:$0xff]  ;;  %v40_v1 = vld [vmem:[%s2172_s3 + $0x50] sm:$0xff]  ;;  %v30_v2 = vld [vmem:[%s2172_s3] sm:$0xff]  ;;  %304 = vmatprep.mubr.f32.mxu0 %v1583_v7  ;;  %381 = vmatprep.mubr.f32.mxu1 %v1583_v7 }
   0x2   :  { %v1358_v3 = vpack.c.bf16 %v40_v1, %v31_v0  ;;  %v39_v4 = vld [vmem:[%s2172_s3 + $0x48] sm:$0xff]  ;;  %v49_v5 = vld [vmem:[%s2172_s3 + $0x98] sm:$0xff]  ;;  %v58_v6 = vld [vmem:[%s2172_s3 + $0xe0] sm:$0xff] }
   0x3   :  { %v1360_v8 = vpack.c.bf16 %v39_v4, %v30_v2  ;;  %v1362_v9 = vpack.c.bf16 %v58_v6, %v49_v5  ;;  %v48_v10 = vld [vmem:[%s2172_s3 + $0x90] sm:$0xff]  ;;  %v57_v11 = vld [vmem:[%s2172_s3 + $0xd8] sm:$0xff]  ;;  %v67_v12 = vld [vmem:[%s2172_s3 + $0x128] sm:$0xff] }
   0x4   :  { %1359 = vmatprep.subr.bf16.mxu0 %v1358_v3  ;;  %v76_v13 = vld [vmem:[%s2172_s3 + $0x170] sm:$0xff]  ;;  %v1364_v14 = vpack.c.bf16 %v57_v11, %v48_v10  ;;  %v66_v16 = vld [vmem:[%s2172_s3 + $0x120] sm:$0xff]  ;;  %v75_v17 = vld [vmem:[%s2172_s3 + $0x168] sm:$0xff] }
   0x5   :  { %1361 = vmatpush1.bf16.msra.mxu0 %v1360_v8  ;;  %v1366_v15 = vpack.c.bf16 %v76_v13, %v67_v12  ;;  %v85_v18 = vld [vmem:[%s2172_s3 + $0x1b8] sm:$0xff]  ;;  %v94_v19 = vld [vmem:[%s2172_s3 + $0x200] sm:$0xff]  ;;  %v1368_v20 = vpack.c.bf16 %v75_v17, %v66_v16  ;;  %v84_v22 = vld [vmem:[%s2172_s3 + $0x1b0] sm:$0xff] }
   0x6   :  { %1363 = vmatprep.subr.bf16.mxu0 %v1362_v9  ;;  %v1370_v21 = vpack.c.bf16 %v94_v19, %v85_v18  ;;  %v93_v23 = vld [vmem:[%s2172_s3 + $0x1f8] sm:$0xff]  ;;  %v103_v24 = vld [vmem:[%s2172_s3 + $0x248] sm:$0xff]  ;;  %v112_v25 = vld [vmem:[%s2172_s3 + $0x290] sm:$0xff] }
   0x7   :  { %v33_v26 = vld [vmem:[%s2172_s3 + $0x18] sm:$0xff]  ;;  %v42_v27 = vld [vmem:[%s2172_s3 + $0x60] sm:$0xff]  ;;  %v32_v28 = vld [vmem:[%s2172_s3 + $0x10] sm:$0xff]  ;;  %v1372_v29 = vpack.c.bf16 %v93_v23, %v84_v22  ;;  %v1374_v34 = vpack.c.bf16 %v112_v25, %v103_v24 }
   0x8   :  { %v102_v30 = vld [vmem:[%s2172_s3 + $0x240] sm:$0xff]  ;;  %v111_v31 = vld [vmem:[%s2172_s3 + $0x288] sm:$0xff]  ;;  %v1390_v32 = vpack.c.bf16 %v42_v27, %v33_v26  ;;  %v41_v33 = vld [vmem:[%s2172_s3 + $0x58] sm:$0xff] }
   0x9   :  { %1365 = vmatpush1.bf16.msra.mxu0 %v1364_v14  ;;  %v121_v35 = vld [vmem:[%s2172_s3 + $0x2d8] sm:$0xff]  ;;  %v130_v36 = vld [vmem:[%s2172_s3 + $0x320] sm:$0xff]  ;;  %v1392_v37 = vpack.c.bf16 %v41_v33, %v32_v28  ;;  %v51_v38 = vld [vmem:[%s2172_s3 + $0xa8] sm:$0xff]  ;;  %v1376_v44 = vpack.c.bf16 %v111_v31, %v102_v30 }
   0xa   :  { %1367 = vmatprep.subr.bf16.mxu0 %v1366_v15  ;;  %1391 = vmatprep.subr.bf16.mxu1 %v1390_v32  ;;  %v60_v39 = vld [vmem:[%s2172_s3 + $0xf0] sm:$0xff]  ;;  %v50_v40 = vld [vmem:[%s2172_s3 + $0xa0] sm:$0xff]  ;;  %v59_v41 = vld [vmem:[%s2172_s3 + $0xe8] sm:$0xff]  ;;  %v1378_v48 = vpack.c.bf16 %v130_v36, %v121_v35 }
   0xb   :  { %1393 = vmatpush1.bf16.msra.mxu1 %v1392_v37  ;;  %v1394_v42 = vpack.c.bf16 %v60_v39, %v51_v38  ;;  %v1396_v43 = vpack.c.bf16 %v59_v41, %v50_v40  ;;  %v120_v45 = vld [vmem:[%s2172_s3 + $0x2d0] sm:$0xff]  ;;  %v69_v46 = vld [vmem:[%s2172_s3 + $0x138] sm:$0xff]  ;;  %v78_v47 = vld [vmem:[%s2172_s3 + $0x180] sm:$0xff] }
   0xc   :  { %v129_v49 = vld [vmem:[%s2172_s3 + $0x318] sm:$0xff]  ;;  %v1398_v50 = vpack.c.bf16 %v78_v47, %v69_v46  ;;  %v68_v51 = vld [vmem:[%s2172_s3 + $0x130] sm:$0xff]  ;;  %v139_v53 = vld [vmem:[%s2172_s3 + $0x368] sm:$0xff] }
   0xd   :  { %1369 = vmatpush1.bf16.msra.mxu0 %v1368_v20  ;;  %1395 = vmatprep.subr.bf16.mxu1 %v1394_v42  ;;  %v77_v52 = vld [vmem:[%s2172_s3 + $0x178] sm:$0xff]  ;;  %v148_v54 = vld [vmem:[%s2172_s3 + $0x3b0] sm:$0xff]  ;;  %v87_v56 = vld [vmem:[%s2172_s3 + $0x1c8] sm:$0xff]  ;;  %v1380_v58 = vpack.c.bf16 %v129_v49, %v120_v45 }
   0xe   :  { %1371 = vmatprep.subr.bf16.mxu0 %v1370_v21  ;;  %v1400_v55 = vpack.c.bf16 %v77_v52, %v68_v51  ;;  %v96_v57 = vld [vmem:[%s2172_s3 + $0x210] sm:$0xff]  ;;  %v86_v60 = vld [vmem:[%s2172_s3 + $0x1c0] sm:$0xff]  ;;  %v95_v61 = vld [vmem:[%s2172_s3 + $0x208] sm:$0xff]  ;;  %v1382_v62 = vpack.c.bf16 %v148_v54, %v139_v53 }
   0xf   :  { %1397 = vmatpush1.bf16.msra.mxu1 %v1396_v43  ;;  %v1402_v59 = vpack.c.bf16 %v96_v57, %v87_v56  ;;  %v138_v63 = vld [vmem:[%s2172_s3 + $0x360] sm:$0xff]  ;;  %v147_v0 = vld [vmem:[%s2172_s3 + $0x3a8] sm:$0xff]  ;;  %v105_v1 = vld [vmem:[%s2172_s3 + $0x258] sm:$0xff]  ;;  %v1404_v5 = vpack.c.bf16 %v95_v61, %v86_v60 }
  0x10   :  { %1399 = vmatprep.subr.bf16.mxu1 %v1398_v50  ;;  %v157_v2 = vld [vmem:[%s2172_s3 + $0x3f8] sm:$0xff]  ;;  %v166_v3 = vld [vmem:[%s2172_s3 + $0x440] sm:$0xff]  ;;  %v1384_v6 = vpack.c.bf16 %v147_v0, %v138_v63  ;;  %v156_v8 = vld [vmem:[%s2172_s3 + $0x3f0] sm:$0xff] }
  0x11   :  { %1373 = vmatpush1.bf16.msra.mxu0 %v1372_v29  ;;  %v114_v4 = vld [vmem:[%s2172_s3 + $0x2a0] sm:$0xff]  ;;  %v104_v10 = vld [vmem:[%s2172_s3 + $0x250] sm:$0xff]  ;;  %v113_v11 = vld [vmem:[%s2172_s3 + $0x298] sm:$0xff]  ;;  %v1386_v12 = vpack.c.bf16 %v166_v3, %v157_v2 }
  0x12   :  { %1375 = vmatprep.subr.bf16.mxu0 %v1374_v34  ;;  %v1406_v9 = vpack.c.bf16 %v114_v4, %v105_v1  ;;  %v165_v13 = vld [vmem:[%s2172_s3 + $0x438] sm:$0xff]  ;;  %v123_v14 = vld [vmem:[%s2172_s3 + $0x2e8] sm:$0xff]  ;;  %v132_v15 = vld [vmem:[%s2172_s3 + $0x330] sm:$0xff]  ;;  %v1408_v18 = vpack.c.bf16 %v113_v11, %v104_v10 }
  0x13   :  { %1401 = vmatpush1.bf16.msra.mxu1 %v1400_v55  ;;  %v35_v16 = vld [vmem:[%s2172_s3 + $0x28] sm:$0xff]  ;;  %v44_v17 = vld [vmem:[%s2172_s3 + $0x70] sm:$0xff]  ;;  %v1388_v19 = vpack.c.bf16 %v165_v13, %v156_v8  ;;  %v34_v20 = vld [vmem:[%s2172_s3 + $0x20] sm:$0xff]  ;;  %v1410_v21 = vpack.c.bf16 %v132_v15, %v123_v14 }
  0x14   :  { %1403 = vmatprep.subr.bf16.mxu1 %v1402_v59  ;;  %v122_v22 = vld [vmem:[%s2172_s3 + $0x2e0] sm:$0xff]  ;;  %v131_v23 = vld [vmem:[%s2172_s3 + $0x328] sm:$0xff]  ;;  %v1422_v24 = vpack.c.bf16 %v44_v17, %v35_v16  ;;  %v141_v26 = vld [vmem:[%s2172_s3 + $0x378] sm:$0xff] }
  0x15   :  { %1377 = vmatpush1.bf16.msra.mxu0 %v1376_v44  ;;  %v43_v25 = vld [vmem:[%s2172_s3 + $0x68] sm:$0xff]  ;;  %v150_v27 = vld [vmem:[%s2172_s3 + $0x3c0] sm:$0xff]  ;;  %v53_v28 = vld [vmem:[%s2172_s3 + $0xb8] sm:$0xff]  ;;  %v1412_v31 = vpack.c.bf16 %v131_v23, %v122_v22 }
  0x16   :  { %1379 = vmatprep.subr.bf16.mxu0 %v1378_v48  ;;  %v62_v29 = vld [vmem:[%s2172_s3 + $0x100] sm:$0xff]  ;;  %v1424_v32 = vpack.c.bf16 %v43_v25, %v34_v20  ;;  %v52_v33 = vld [vmem:[%s2172_s3 + $0xb0] sm:$0xff]  ;;  %v1414_v34 = vpack.c.bf16 %v150_v27, %v141_v26  ;;  %v149_v36 = vld [vmem:[%s2172_s3 + $0x3b8] sm:$0xff] }
  0x17   :  { %1405 = vmatpush1.bf16.msra.mxu1 %v1404_v5  ;;  %v1820_v30 = vld [vmem:[%s2171_s2] sm:$0xff]  ;;  %v140_v35 = vld [vmem:[%s2172_s3 + $0x370] sm:$0xff]  ;;  %v1426_v37 = vpack.c.bf16 %v62_v29, %v53_v28  ;;  %v61_v38 = vld [vmem:[%s2172_s3 + $0xf8] sm:$0xff] }
  0x18   :  { %1407 = vmatprep.subr.bf16.mxu1 %v1406_v9  ;;  %v159_v39 = vld [vmem:[%s2172_s3 + $0x408] sm:$0xff]  ;;  %v168_v40 = vld [vmem:[%s2172_s3 + $0x450] sm:$0xff] }
  0x19   :  { %1381 = vmatpush1.bf16.msra.mxu0 %v1380_v58  ;;  %v71_v41 = vld [vmem:[%s2172_s3 + $0x148] sm:$0xff]  ;;  %v80_v42 = vld [vmem:[%s2172_s3 + $0x190] sm:$0xff] }
  0x1a   :  { %1383 = vmatprep.subr.bf16.mxu0 %v1382_v62 }
  0x1b   :  { %1409 = vmatpush1.bf16.msra.mxu1 %v1408_v18 }
  0x1c   :  { %1411 = vmatprep.subr.bf16.mxu1 %v1410_v21 }
  0x1d   :  { %1385 = vmatpush1.bf16.msra.mxu0 %v1384_v6 }
  0x1e   :  { %1387 = vmatprep.subr.bf16.mxu0 %v1386_v12 }
  0x21   :  { %1389 = vmatpush1.bf16.msra.mxu0 %v1388_v19 }
  0x22   :  { %1423 = vmatprep.subr.bf16.mxu0 %v1422_v24 }
  0x23   :  { %11 = vsyncpa [#allocation3], 0  ;;  %v70_v43 = vld [vmem:[%s2172_s3 + $0x140] sm:$0xff]  ;;  %1413 = vmatpush1.bf16.msra.mxu1 %v1412_v31  ;;  %v1416_v44 = vpack.c.bf16 %v149_v36, %v140_v35  ;;  %v1428_v45 = vpack.c.bf16 %v61_v38, %v52_v33  ;;  %v1853_v46 = vld [vmem:[%s2171_s2 + $0x8] sm:$0xff]  ;;  %v1418_v47 = vpack.c.bf16 %v168_v40, %v159_v39  ;;  %v1430_v50 = vpack.c.bf16 %v80_v42, %v71_v41 }
  0x24   :  { %305 = vmatmul.mubr.f32.vlgmr.msra.gmra.mrb[0].mxu0 %v1820_v30  ;;  %1415 = vmatprep.subr.bf16.mxu1 %v1414_v34  ;;  %v158_v48 = vld [vmem:[%s2172_s3 + $0x400] sm:$0xff]  ;;  %v167_v49 = vld [vmem:[%s2172_s3 + $0x448] sm:$0xff]  ;;  %v37_v52 = vld [vmem:[%s2172_s3 + $0x38] sm:$0xff]  ;;  %vm1584_vm0 = vmmov 0   ;;  %vm623_vm1 = vcmask 64512  }
  0x25   :  { %1425 = vmatpush1.bf16.msra.mxu0 %v1424_v32  ;;  %v79_v51 = vld [vmem:[%s2172_s3 + $0x188] sm:$0xff]  ;;  %310 = vmatprep.mubr.f32.mxu0 %v1583_v7  ;;  %v46_v53 = vld [vmem:[%s2172_s3 + $0x80] sm:$0xff]  ;;  %v89_v54 = vld [vmem:[%s2172_s3 + $0x1d8] sm:$0xff]  ;;  %v1420_v56 = vpack.c.bf16 %v167_v49, %v158_v48 }
  0x26   :  { %1427 = vmatprep.subr.bf16.mxu0 %v1426_v37  ;;  %v98_v55 = vld [vmem:[%s2172_s3 + $0x220] sm:$0xff]  ;;  %v1432_v57 = vpack.c.bf16 %v79_v51, %v70_v43  ;;  %v1454_v58 = vpack.c.bf16 %v46_v53, %v37_v52  ;;  %v36_v59 = vld [vmem:[%s2172_s3 + $0x30] sm:$0xff]  ;;  %v45_v60 = vld [vmem:[%s2172_s3 + $0x78] sm:$0xff] }
  0x27   :  { %1417 = vmatpush1.bf16.msra.mxu1 %v1416_v44  ;;  %v1434_v61 = vpack.c.bf16 %v98_v55, %v89_v54  ;;  %v88_v62 = vld [vmem:[%s2172_s3 + $0x1d0] sm:$0xff]  ;;  %v97_v63 = vld [vmem:[%s2172_s3 + $0x218] sm:$0xff]  ;;  %v107_v0 = vld [vmem:[%s2172_s3 + $0x268] sm:$0xff]  ;;  %v1456_v2 = vpack.c.bf16 %v45_v60, %v36_v59 }
  0x28   :  { %311 = vmatmul.mubr.f32.gmra.mrb[2].mxu0 %v1853_v46  ;;  %1419 = vmatprep.subr.bf16.mxu1 %v1418_v47  ;;  %v116_v1 = vld [vmem:[%s2172_s3 + $0x2b0] sm:$0xff]  ;;  %v1436_v3 = vpack.c.bf16 %v97_v63, %v88_v62  ;;  %v106_v5 = vld [vmem:[%s2172_s3 + $0x260] sm:$0xff]  ;;  %v115_v6 = vld [vmem:[%s2172_s3 + $0x2a8] sm:$0xff] }
  0x29   :  { %1429 = vmatpush1.bf16.msra.mxu0 %v1428_v45  ;;  %458 = vmatprep.mubr.f32.mxu0 %v1583_v7  ;;  %v1438_v4 = vpack.c.bf16 %v116_v1, %v107_v0  ;;  %v125_v8 = vld [vmem:[%s2172_s3 + $0x2f8] sm:$0xff]  ;;  %v134_v9 = vld [vmem:[%s2172_s3 + $0x340] sm:$0xff]  ;;  %v1440_v10 = vpack.c.bf16 %v115_v6, %v106_v5  ;;  %v124_v12 = vld [vmem:[%s2172_s3 + $0x2f0] sm:$0xff] }
  0x2a   :  { %1431 = vmatprep.subr.bf16.mxu0 %v1430_v50  ;;  %v1442_v11 = vpack.c.bf16 %v134_v9, %v125_v8  ;;  %v133_v13 = vld [vmem:[%s2172_s3 + $0x338] sm:$0xff]  ;;  %v143_v14 = vld [vmem:[%s2172_s3 + $0x388] sm:$0xff]  ;;  %v152_v15 = vld [vmem:[%s2172_s3 + $0x3d0] sm:$0xff] }
  0x2b   :  { %1421 = vmatpush1.bf16.msra.mxu1 %v1420_v56  ;;  %v1444_v16 = vpack.c.bf16 %v133_v13, %v124_v12  ;;  %v1446_v17 = vpack.c.bf16 %v152_v15, %v143_v14  ;;  %v142_v18 = vld [vmem:[%s2172_s3 + $0x380] sm:$0xff]  ;;  %v151_v19 = vld [vmem:[%s2172_s3 + $0x3c8] sm:$0xff]  ;;  %v161_v20 = vld [vmem:[%s2172_s3 + $0x418] sm:$0xff] }
  0x2c   :  { %1455 = vmatprep.subr.bf16.mxu1 %v1454_v58  ;;  %v170_v21 = vld [vmem:[%s2172_s3 + $0x460] sm:$0xff]  ;;  %v1448_v22 = vpack.c.bf16 %v151_v19, %v142_v18  ;;  %v160_v24 = vld [vmem:[%s2172_s3 + $0x410] sm:$0xff]  ;;  %v169_v25 = vld [vmem:[%s2172_s3 + $0x458] sm:$0xff] }
  0x2d   :  { %1433 = vmatpush1.bf16.msra.mxu0 %v1432_v57  ;;  %v1450_v23 = vpack.c.bf16 %v170_v21, %v161_v20  ;;  %v1452_v26 = vpack.c.bf16 %v169_v25, %v160_v24  ;;  %v55_v27 = vld [vmem:[%s2172_s3 + $0xc8] sm:$0xff]  ;;  %v64_v28 = vld [vmem:[%s2172_s3 + $0x110] sm:$0xff]  ;;  %v54_v31 = vld [vmem:[%s2172_s3 + $0xc0] sm:$0xff] }
  0x2e   :  { %1435 = vmatprep.subr.bf16.mxu0 %v1434_v61  ;;  %382 = vmatmul.mubr.f32.vlgmr.msra.gmra.mrb[0].mxu1 %v1820_v30  ;;  %v1458_v29 = vpack.c.bf16 %v64_v28, %v55_v27  ;;  %v63_v32 = vld [vmem:[%s2172_s3 + $0x108] sm:$0xff]  ;;  %v73_v34 = vld [vmem:[%s2172_s3 + $0x158] sm:$0xff]  ;;  %v82_v35 = vld [vmem:[%s2172_s3 + $0x1a0] sm:$0xff] }
  0x2f   :  { %387 = vmatprep.mubr.f32.mxu1 %v1583_v7  ;;  %1457 = vmatpush1.bf16.msra.mxu1 %v1456_v2  ;;  %v1460_v33 = vpack.c.bf16 %v63_v32, %v54_v31  ;;  %v72_v36 = vld [vmem:[%s2172_s3 + $0x150] sm:$0xff]  ;;  %v1462_v37 = vpack.c.bf16 %v82_v35, %v73_v34  ;;  %v81_v38 = vld [vmem:[%s2172_s3 + $0x198] sm:$0xff]  ;;  %v91_v39 = vld [vmem:[%s2172_s3 + $0x1e8] sm:$0xff]  ;;  %v178_v35 = vlaneseq }
  0x30   :  { %1459 = vmatprep.subr.bf16.mxu1 %v1458_v29  ;;  %v100_v40 = vld [vmem:[%s2172_s3 + $0x230] sm:$0xff]  ;;  %v1464_v41 = vpack.c.bf16 %v81_v38, %v72_v36  ;;  %v90_v43 = vld [vmem:[%s2172_s3 + $0x1e0] sm:$0xff]  ;;  %v99_v44 = vld [vmem:[%s2172_s3 + $0x228] sm:$0xff] }
  0x31   :  { %1437 = vmatpush1.bf16.msra.mxu0 %v1436_v3  ;;  %v1466_v42 = vpack.c.bf16 %v100_v40, %v91_v39  ;;  %v109_v45 = vld [vmem:[%s2172_s3 + $0x278] sm:$0xff]  ;;  %v118_v47 = vld [vmem:[%s2172_s3 + $0x2c0] sm:$0xff]  ;;  %v1468_v48 = vpack.c.bf16 %v99_v44, %v90_v43  ;;  %v47_v50 = vld [vmem:[%s2172_s3 + $0x88] sm:$0xff]  ;;  %v2089_v38 = vshrl.u32 %v178_v35, 7 }
  0x32   :  { %1439 = vmatprep.subr.bf16.mxu0 %v1438_v4  ;;  %388 = vmatmul.mubr.f32.gmra.mrb[2].mxu1 %v1853_v46  ;;  %v38_v49 = vld [vmem:[%s2172_s3 + $0x40] sm:$0xff]  ;;  %v1470_v51 = vpack.c.bf16 %v118_v47, %v109_v45  ;;  %v108_v52 = vld [vmem:[%s2172_s3 + $0x270] sm:$0xff]  ;;  %v117_v53 = vld [vmem:[%s2172_s3 + $0x2b8] sm:$0xff] }
  0x33   :  { %535 = vmatprep.mubr.f32.mxu1 %v1583_v7  ;;  %1461 = vmatpush1.bf16.msra.mxu1 %v1460_v33  ;;  %v1486_v54 = vpack.c.bf16 %v47_v50, %v38_v49  ;;  %v127_v55 = vld [vmem:[%s2172_s3 + $0x308] sm:$0xff]  ;;  %v136_v56 = vld [vmem:[%s2172_s3 + $0x350] sm:$0xff]  ;;  %v65_v58 = vld [vmem:[%s2172_s3 + $0x118] sm:$0xff]  ;;  %v1472_v60 = vpack.c.bf16 %v117_v53, %v108_v52  ;;  %v188_v39 = vsub.s32 2, %v2089_v38  ;;  %v192_v49 = vsub.s32 3, %v2089_v38 }
  0x34   :  { %1463 = vmatprep.subr.bf16.mxu1 %v1462_v37  ;;  %v56_v57 = vld [vmem:[%s2172_s3 + $0xd0] sm:$0xff]  ;;  %v74_v61 = vld [vmem:[%s2172_s3 + $0x160] sm:$0xff]  ;;  %v83_v62 = vld [vmem:[%s2172_s3 + $0x1a8] sm:$0xff]  ;;  %v1474_v63 = vpack.c.bf16 %v136_v56, %v127_v55  ;;  %v196_v50 = vsub.s32 4, %v2089_v38  ;;  %v200_v52 = vsub.s32 5, %v2089_v38 }
  0x35   :  { %1441 = vmatpush1.bf16.msra.mxu0 %v1440_v10  ;;  %v1490_v59 = vpack.c.bf16 %v65_v58, %v56_v57  ;;  %v126_v0 = vld [vmem:[%s2172_s3 + $0x300] sm:$0xff]  ;;  %v135_v1 = vld [vmem:[%s2172_s3 + $0x348] sm:$0xff]  ;;  %v145_v2 = vld [vmem:[%s2172_s3 + $0x398] sm:$0xff]  ;;  %v1494_v3 = vpack.c.bf16 %v83_v62, %v74_v61  ;;  %v184_v62 = vsub.s32 1, %v2089_v38 }
  0x36   :  { %1443 = vmatprep.subr.bf16.mxu0 %v1442_v11  ;;  %v154_v4 = vld [vmem:[%s2172_s3 + $0x3e0] sm:$0xff]  ;;  %v92_v5 = vld [vmem:[%s2172_s3 + $0x1f0] sm:$0xff]  ;;  %v101_v6 = vld [vmem:[%s2172_s3 + $0x238] sm:$0xff]  ;;  %v1476_v8 = vpack.c.bf16 %v135_v1, %v126_v0 }
  0x37   :  { %1465 = vmatpush1.bf16.msra.mxu1 %v1464_v41  ;;  %v1478_v9 = vpack.c.bf16 %v154_v4, %v145_v2  ;;  %v144_v10 = vld [vmem:[%s2172_s3 + $0x390] sm:$0xff]  ;;  %v153_v11 = vld [vmem:[%s2172_s3 + $0x3d8] sm:$0xff]  ;;  %v163_v12 = vld [vmem:[%s2172_s3 + $0x428] sm:$0xff]  ;;  %v1498_v13 = vpack.c.bf16 %v101_v6, %v92_v5  ;;  %v180_v2 = vsub.s32 0, %v2089_v38 }
  0x38   :  { %1467 = vmatprep.subr.bf16.mxu1 %v1466_v42  ;;  %v172_v14 = vld [vmem:[%s2172_s3 + $0x470] sm:$0xff]  ;;  %v110_v15 = vld [vmem:[%s2172_s3 + $0x280] sm:$0xff]  ;;  %v171_v20 = vld [vmem:[%s2172_s3 + $0x468] sm:$0xff] }
  0x39   :  { %1445 = vmatpush1.bf16.msra.mxu0 %v1444_v16  ;;  %v119_v16 = vld [vmem:[%s2172_s3 + $0x2c8] sm:$0xff]  ;;  %v1482_v18 = vpack.c.bf16 %v172_v14, %v163_v12  ;;  %v162_v19 = vld [vmem:[%s2172_s3 + $0x420] sm:$0xff]  ;;  %v137_v24 = vld [vmem:[%s2172_s3 + $0x358] sm:$0xff] }
  0x3a   :  { %1447 = vmatprep.subr.bf16.mxu0 %v1446_v17  ;;  %v1480_v17 = vpack.c.bf16 %v153_v11, %v144_v10  ;;  %v1502_v21 = vpack.c.bf16 %v119_v16, %v110_v15  ;;  %v155_v27 = vld [vmem:[%s2172_s3 + $0x3e8] sm:$0xff]  ;;  %v164_v29 = vld [vmem:[%s2172_s3 + $0x430] sm:$0xff]  ;;  %v173_v31 = vld [vmem:[%s2172_s3 + $0x478] sm:$0xff] }
  0x3b   :  { %1469 = vmatpush1.bf16.msra.mxu1 %v1468_v48  ;;  %v1514_v32 = vpack.c.bf16 %v173_v31, %v164_v29  ;;  %v2095_v42 = vld [vmem:[%s2173_s4] sm:$0xff]  ;;  %v27_v48 = vld [vmem:[%s2169_s0 + $0x8] sm:$0xff] }
  0x3c   :  { %1471 = vmatprep.subr.bf16.mxu1 %v1470_v51  ;;  %v189_v43 = vrot.slane %v2095_v42, %v188_v39  ;;  %v193_v51 = vrot.slane %v2095_v42, %v192_v49  ;;  %v197_v53 = vrot.slane %v2095_v42, %v196_v50  ;;  %v201_v56 = vrot.slane %v2095_v42, %v200_v52  ;;  %v29_v4 = vld [vmem:[%s2170_s1 + $0x8] sm:$0xff]  ;;  %v26_v10 = vld [vmem:[%s2169_s0] sm:$0xff] }
  0x3d   :  { %1449 = vmatpush1.bf16.msra.mxu0 %v1448_v22  ;;  %v1484_v22 = vpack.c.bf16 %v171_v20, %v162_v19  ;;  %v181_v5 = vrot.slane %v2095_v42, %v180_v2  ;;  %v204_v20 = vsub.s32 6, %v2089_v38  ;;  %v1264_v52 = vld [vmem:[%s2173_s4 + $0x8] ss:$0 sm:$0xff]  ;;  %s1585_s4 = smov [#allocation2]  }
  0x3e   :  { %1451 = vmatprep.subr.bf16.mxu0 %v1450_v23  ;;  %v128_v23 = vld [vmem:[%s2172_s3 + $0x310] sm:$0xff]  ;;  %s1253_s29 = sshll.u32 %s1585_s4, 4  ;;  %s1254_s29 = int_to_ptr.vmem [resolvable:$true] %s1253_s29 }
  0x3f   :  { %1473 = vmatpush1.bf16.msra.mxu1 %v1472_v60  ;;  %v1506_v25 = vpack.c.bf16 %v137_v24, %v128_v23  ;;  %s1559_s30 = scalar_lea.vmem %s1254_s29, 256  ;;  %p1564_p1 = scmp.lt.s32.totalorder %s1254_s29, %s1254_s29 }
  0x40   :  { %1475 = vmatprep.subr.bf16.mxu1 %v1474_v63  ;;  %p1560_p0 = scmp.ne.s32.totalorder %s1254_s29, %s1559_s30  ;;  %p1565_p2 = scmp.lt.s32.totalorder %s1559_s30, %s1559_s30 }
  0x41   :  { %1453 = vmatpush1.bf16.msra.mxu0 %v1452_v26  ;;  %v146_v26 = vld [vmem:[%s2172_s3 + $0x3a0] sm:$0xff] }
  0x42   :  { %1487 = vmatprep.subr.bf16.mxu0 %v1486_v54  ;;  %v1510_v28 = vpack.c.bf16 %v155_v27, %v146_v26  ;;  %v208_v26 = vsub.s32 7, %v2089_v38  ;;  %p1566_p3 = por %p1565_p2, %p1564_p1 }
  0x43   :  { %1477 = vmatpush1.bf16.msra.mxu1 %v1476_v8 }
  0x44   :  { %459 = vmatmul.mubr.f32.vlgmr.msra.gmra.mrb[4].mxu0 %v1820_v30  ;;  %1479 = vmatprep.subr.bf16.mxu1 %v1478_v9  ;;  %v209_v31 = vrot.slane %v2095_v42, %v208_v26  ;;  %p1567_p4 = pnand %p1566_p3, %p1560_p0 }
  0x45   :  { %464 = vmatprep.mubr.f32.mxu0 %v1583_v7  ;;  %1489 = vmatpush3.bf16.msra.mxu0 %v1486_v54 }
  0x46   :  { %1491 = vmatprep.subr.bf16.mxu0 %v1490_v59 }
  0x47   :  { %1481 = vmatpush1.bf16.msra.mxu1 %v1480_v17 }
  0x48   :  { %465 = vmatmul.mubr.f32.gmra.mrb[6].mxu0 %v1853_v46  ;;  %1483 = vmatprep.subr.bf16.mxu1 %v1482_v18 }
  0x49   :  { %1335 = vmatprep.mubr.f32.mxu0 %v1820_v30  ;;  %1493 = vmatpush3.bf16.msra.mxu0 %v1490_v59  ;;  %v28_v59 = vld [vmem:[%s2170_s1] sm:$0xff] }
  0x4a   :  { %1495 = vmatprep.subr.bf16.mxu0 %v1494_v3 }
  0x4b   :  { %1485 = vmatpush1.bf16.msra.mxu1 %v1484_v22  ;;  %v205_v22 = vrot.slane %v2095_v42, %v204_v20 }
  0x4d   :  { %1497 = vmatpush3.bf16.msra.mxu0 %v1494_v3  ;;  %v185_v3 = vrot.slane %v2095_v42, %v184_v62 }
  0x4e   :  { %1499 = vmatprep.subr.bf16.mxu0 %v1498_v13  ;;  %536 = vmatmul.mubr.f32.vlgmr.msra.gmra.mrb[4].mxu1 %v1820_v30 }
  0x4f   :  { %541 = vmatprep.mubr.f32.mxu1 %v1583_v7 }
  0x51   :  { %1501 = vmatpush3.bf16.msra.mxu0 %v1498_v13 }
  0x52   :  { %1503 = vmatprep.subr.bf16.mxu0 %v1502_v21  ;;  %542 = vmatmul.mubr.f32.gmra.mrb[6].mxu1 %v1853_v46 }
  0x53   :  { %691 = vmatprep.mubr.f32.mxu1 %v1583_v7 }
  0x55   :  { %1505 = vmatpush3.bf16.msra.mxu0 %v1502_v21  ;;  %v223_v21 = vld [vmem:[%s2174_s5] sm:$0x7] }
  0x56   :  { %1507 = vmatprep.subr.bf16.mxu0 %v1506_v25  ;;  %v228_v23 = vrot.slane %v223_v21, %v180_v2 }
  0x59   :  { %1509 = vmatpush3.bf16.msra.mxu0 %v1506_v25 }
  0x5a   :  { %1511 = vmatprep.subr.bf16.mxu0 %v1510_v28 }
  0x5d   :  { %1513 = vmatpush3.bf16.msra.mxu0 %v1510_v28 }
  0x5e   :  { %1515 = vmatprep.subr.bf16.mxu0 %v1514_v32 }
  0x61   :  { %1517 = vmatpush3.bf16.msra.mxu0 %v1514_v32  ;;  %v232_v32 = vrot.slane %v223_v21, %v184_v62 }
  0x62   :  { %1353 = vmatprep.subr.mxu0 %v1583_v7 }
  0x64   :  { %1336 = vmatmul.mubr.f32.vlgmr.msra.gmra.mrb[8].mxu0 %v1853_v46 }
  0x65   :  { %1355 = vmatprep.mubr.msk.f32.mxu0 %vm1584_vm0, %v1583_v7 }
  0xf7   :  { %v306_v33 = vpop.f32.mrb[0].mxu0 }
  0xf8   :  { %v308_v34 = vpop.f32.mrb[1].mxu0  ;;  %v307_v9 = vadd.f32 %v306_v33, %v181_v5 }
  0xf9   :  { %v309_v8 = vadd.f32 %v308_v34, %v185_v3 }
  0xfb   :  { %v2087_v36 = vpop.f32.mrb[2].mxu0 }
  0xfc   :  { %v314_v37 = vpop.f32.mrb[3].mxu0  ;;  %v313_v13 = vadd.f32 %v2087_v36, %v181_v5  ;;  %v1520_v36 = vadd.f32 %v232_v32, %v209_v31 }
  0xfd   :  { %v315_v12 = vadd.f32 %v314_v37, %v185_v3 }
 0x101   :  { %v383_v40 = vpop.f32.mrb[0].mxu1 }
 0x102   :  { %v385_v41 = vpop.f32.mrb[1].mxu1  ;;  %v384_v11 = vadd.f32 %v383_v40, %v189_v43 }
 0x103   :  { %v386_v54 = vadd.f32 %v385_v41, %v193_v51 }
 0x105   :  { %v389_v44 = vpop.f32.mrb[2].mxu1 }
 0x106   :  { %v390_v45 = vadd.f32 %v389_v44, %v189_v43  ;;  %v391_v47 = vpop.f32.mrb[3].mxu1 }
 0x107   :  { %v392_v1 = vadd.f32 %v391_v47, %v193_v51 }
 0x108   :  { %1354 = vmatpush3.msra.mxu0 %v390_v45 }
 0x109   :  { %1356 = vmatmul.mubr.msk.f32.vlgmr.msra.gmra.mrb[10].mxu0 %vm623_vm1, %v27_v48 }
 0x117   :  { %v460_v55 = vpop.f32.mrb[4].mxu0 }
 0x118   :  { %v461_v57 = vadd.f32 %v460_v55, %v197_v53  ;;  %v462_v58 = vpop.f32.mrb[5].mxu0 }
 0x119   :  { %v463_v60 = vadd.f32 %v462_v58, %v201_v56 }
 0x11a   :  { %627 = vmatprep.subr.mxu1 %v461_v57  ;;  %v236_v57 = vrot.slane %v223_v21, %v188_v39 }
 0x11b   :  { %628 = vmatpush1.msra.mxu1 %v386_v54  ;;  %v466_v61 = vpop.f32.mrb[6].mxu0 }
 0x11c   :  { %1265 = vmatmul.mubr.msk.f32.vlgmr.msra.gmra.mrb[4].mxu1 %vm623_vm1, %v28_v59  ;;  %1338 = vmatprep.subr.mxu1 %v1583_v7  ;;  %v467_v63 = vadd.f32 %v466_v61, %v197_v53  ;;  %v468_v0 = vpop.f32.mrb[7].mxu0 }
 0x11d   :  { %1339 = vmatpush3.msra.mxu1 %v463_v60  ;;  %1340 = vmatprep.mubr.msk.f32.mxu1 %vm1584_vm0, %v1583_v7  ;;  %v469_v6 = vadd.f32 %v468_v0, %v201_v56 }
 0x11e   :  { %771 = vmatprep.subr.mxu1 %v467_v63 }
 0x120   :  { %1341 = vmatmul.mubr.msk.f32.vlgmr.msra.gmra.mrb[8].mxu1 %vm623_vm1, %v28_v59 }
 0x121   :  { %772 = vmatpush1.msra.mxu1 %v392_v1  ;;  %835 = vmatprep.mubr.f32.mxu1 %v1583_v7 }
 0x122   :  { %1343 = vmatprep.subr.mxu1 %v1583_v7 }
 0x124   :  { %1267 = vmatmul.mubr.msk.f32.vlgmr.msra.gmra.mrb[6].mxu1 %vm623_vm1, %v29_v4 }
 0x125   :  { %1344 = vmatpush3.msra.mxu1 %v469_v6  ;;  %1345 = vmatprep.mubr.msk.f32.mxu1 %vm1584_vm0, %v1583_v7 }
 0x126   :  { %915 = vmatprep.subr.mxu1 %v309_v8 }
 0x128   :  { %1346 = vmatmul.mubr.msk.f32.vlgmr.msra.gmra.mrb[10].mxu1 %vm623_vm1, %v29_v4 }
 0x129   :  { %916 = vmatpush1.msra.mxu1 %v307_v9  ;;  %979 = vmatprep.mubr.f32.mxu1 %v1583_v7 }
 0x12a   :  { %1348 = vmatprep.subr.mxu1 %v1583_v7 }
 0x12c   :  { %1269 = vmatmul.mubr.msk.f32.vlgmr.msra.gmra.mrb[4].mxu1 %vm623_vm1, %v26_v10 }
 0x12d   :  { %1349 = vmatpush3.msra.mxu1 %v384_v11  ;;  %1350 = vmatprep.mubr.msk.f32.mxu1 %vm1584_vm0, %v1583_v7 }
 0x12e   :  { %1059 = vmatprep.subr.mxu1 %v315_v12 }
 0x130   :  { %1351 = vmatmul.mubr.msk.f32.vlgmr.msra.gmra.mrb[12].mxu1 %vm623_vm1, %v26_v10 }
 0x131   :  { %1060 = vmatpush1.msra.mxu1 %v313_v13  ;;  %1123 = vmatprep.mubr.f32.mxu1 %v1583_v7  ;;  %v1518_v7 = vadd.f32 %v228_v23, %v205_v22 }
 0x134   :  { %1271 = vmatmul.mubr.msk.f32.vlgmr.msra.gmra.mrb[6].mxu1 %vm623_vm1, %v27_v48 }
 0x137   :  { %v1337_v14 = vpop.f32.mrb[8].mxu0 }
 0x138   :  { %v614_v15 = vpop.f32.mrb[9].mxu0  ;;  %v620_v0 = vadd.f32 %v1337_v14, %v1264_v52 }
 0x139   :  { %v615_v55 = vadd.f32 %v1264_v52, %v614_v15 }
 0x1dc   :  { %v1196_v16 = vpop.f32.mrb[10].mxu0 }
 0x1dd   :  { %v1357_v17 = vpop.f32.mrb[11].mxu0 }
 0x1f3   :  { %v764_v18 = vpop.f32.mrb[8].mxu1 }
 0x1f4   :  { %v1342_v19 = vpop.f32.mrb[9].mxu1 }
 0x1fb   :  { %v908_v24 = vpop.f32.mrb[10].mxu1 }
 0x1fc   :  { %v1347_v25 = vpop.f32.mrb[11].mxu1  ;;  %v1197_v27 = vadd.f32 %v1196_v16, %v908_v24 }
 0x1fe   :  { %v1205_v2 = vadd.f32 %v1197_v27, %v236_v57 }
 0x1ff   :  { %v981_v28 = vpop.f32.mrb[4].mxu1 }
 0x200   :  { %v1519_v29 = vadd.f32 %v1518_v7, %v981_v28  ;;  %v983_v33 = vpop.f32.mrb[5].mxu1 }
 0x201   :  { %v1521_v43 = vadd.f32 %v1520_v36, %v983_v33 }
 0x202   :  { %v1273_v34 = vmul.f32 -1.442695, %v1519_v29 }
 0x203   :  { %v1052_v35 = vpop.f32.mrb[12].mxu1  ;;  %v1275_v48 = vmul.f32 -1.442695, %v1521_v43 }
 0x204   :  { %1539 = vpow2.f32 %v1273_v34  ;;  %v1053_v37 = vadd.f32 %v1052_v35, %v764_v18  ;;  %v1352_v40 = vpop.f32.mrb[13].mxu1 }
 0x206   :  { %v1202_v60 = vadd.f32 %v1053_v37, %v236_v57 }
 0x207   :  { %v1125_v41 = vpop.f32.mrb[6].mxu1 }
 0x208   :  { %v1523_v44 = vadd.f32 %v1518_v7, %v1125_v41  ;;  %v1127_v45 = vpop.f32.mrb[7].mxu1 }
 0x209   :  { %v1525_v51 = vadd.f32 %v1520_v36, %v1127_v45 }
 0x20a   :  { %v1274_v47 = vmul.f32 -1.442695, %v1523_v44 }
 0x20b   :  { %v1276_v42 = vmul.f32 -1.442695, %v1525_v51 }
 0x20c   :  { %1541 = vpow2.f32 %v1274_v47 }
 0x20d   :  { %1543 = vpow2.f32 %v1275_v48 }
 0x20e   :  { %v1540_v49 = vpop.eup %1539 }
 0x20f   :  { %v1214_v50 = vadd.f32 1.0, %v1540_v49 }
 0x211   :  { %1545 = vrcp.f32 %v1214_v50 }
 0x212   :  { %1547 = vpow2.f32 %v1276_v42 }
 0x216   :  { %v1542_v53 = vpop.eup %1541 }
 0x217   :  { %v1215_v54 = vadd.f32 1.0, %v1542_v53  ;;  %v1544_v56 = vpop.eup %1543 }
 0x218   :  { %v1228_v61 = vadd.f32 1.0, %v1544_v56 }
 0x219   :  { %1549 = vrcp.f32 %v1215_v54 }
 0x21b   :  { %v1546_v58 = vpop.eup %1545 }
 0x21c   :  { %v1234_v59 = vmul.f32 %v1546_v58, %v615_v55  ;;  %v1548_v63 = vpop.eup %1547 }
 0x21d   :  { %v1229_v5 = vadd.f32 1.0, %v1548_v63 }
 0x21e   :  { %v1236_v62 = vadd.f32 %v1234_v59, %v1202_v60 }
 0x220   :  { %1551 = vtanh.f32 %v1236_v62 }
 0x221   :  { %1553 = vrcp.f32 %v1228_v61 }
 0x223   :  { %v1550_v1 = vpop.eup %1549 }
 0x224   :  { %v1235_v3 = vmul.f32 %v1550_v1, %v620_v0 }
 0x226   :  { %v1237_v4 = vadd.f32 %v1235_v3, %v1205_v2 }
 0x228   :  { %1555 = vtanh.f32 %v1237_v4 }
 0x229   :  { %1557 = vrcp.f32 %v1229_v5 }
 0x22a   :  { %v1552_v6 = vpop.eup %1551 }
 0x22b   :  { %v1240_v38 = vsub.f32 %v1820_v30, %v1552_v6  ;;  %v1554_v39 = vpop.eup %1553 }
 0x22d   :  { %v1242_v8 = vmul.f32 %v1554_v39, %v1240_v38 }
 0x22f   :  { %v1244_v9 = vadd.f32 %v1552_v6, %v1242_v8 }
 0x231   :  { %1246 = vst [vmem:[#allocation2] sm:$0xff] %v1244_v9 }
 0x232   :  { %v1556_v10 = vpop.eup %1555 }
 0x233   :  { %v1241_v11 = vsub.f32 %v1853_v46, %v1556_v10  ;;  %v1558_v12 = vpop.eup %1557 }
 0x235   :  { %v1243_v13 = vmul.f32 %v1558_v12, %v1241_v11 }
 0x237   :  { %v1245_v14 = vadd.f32 %v1556_v10, %v1243_v13 }
 0x239   :  { %1247 = vst [vmem:[#allocation2 + $0x8] sm:$0xff] %v1245_v14 }
 0x23a   :  { %1570 = shalt.err (!%p1567_p4)
}
 0x23b   :  { %s1571_s9 = scalar_lea.hbm %s2175_s6, 256 }
 0x23c   :  { %p1572_p5 = scmp.ne.s32.totalorder %s2175_s6, %s1571_s9  ;;  %p1575_p6 = scmp.lt.u32.totalorder %s1571_s9, %s2175_s6 }
 0x23e   :  { %p1577_p7 = pnand %p1575_p6, %p1572_p5 }
 0x240   :  { %1580 = shalt.err (!%p1577_p7)
}
 0x241   :  { %s1586_s13 = smov 128   ;;  %s1587_s14 = smov 8  }
 0x242   :  { %1259 = dma.vmem_to_hbm [thread:$0]  %s1254_s29, 256, %s2175_s6, [#allocation3], %s1586_s13, %s1586_s13, %s1587_s14  }
 0x243   :  { %1581 = dma.done.wait [#allocation3], 256  }
 0x244   :  { %1582 = vsyncadd [#allocation3], 4294967040 }
 0x245   :  { %1263 = vsyncpa [#allocation3], 1 }

</bundles_post_ra>
